<compile_context>
chip_gen: v6e
topology: v6e:2x2x1
jax: 0.10.0
libtpu: 0.0.40
codegen_flags: <defaults>
</compile_context>

<pallas_src>
import jax
import jax.numpy as jnp
from jax.experimental import pallas as pl
from jax.experimental.pallas import tpu as pltpu


def _round_up(x: int, m: int) -> int:
    return ((x + m - 1) // m) * m


def _default_compute_dtype():
    """bf16 VPU exists on v6e/v7x; v5e and older emulate bf16, so keep f32 there."""
    try:
        kind = jax.devices()[0].device_kind.lower()
    except Exception:
        return jnp.float32
    for old in ("v2", "v3", "v4", "v5"):
        if old in kind:
            return jnp.float32
    return jnp.bfloat16


def _make_hitmiss_kernel(c_out: int, out_lanes: int):
    """Per-channel erosion/dilation lane-reductions over an (n_tile, P) tile, one dense store."""

    def kernel(x_ref, khit_ref, kmiss_ref, out_ref):
        # x_ref    : (n_tile, P)      image rows (compute dtype)
        # khit_ref : (C, P)           hit structuring elements
        # kmiss_ref: (C, P)           miss structuring elements
        # out_ref  : (n_tile, LANES)  f32 slab: [out(C) | hit(C) | miss(C) | zero pad]
        x = x_ref[...]
        n_rows = x.shape[0]
        diff_cols, hit_cols, miss_cols = [], [], []
        for c in range(c_out):                               # C is small (10): static unroll
            kh = khit_ref[c:c + 1, :]                        # (1, P), broadcast over batch rows
            km = kmiss_ref[c:c + 1, :]
            hit_c = jnp.min(x - kh, axis=-1, keepdims=True).astype(jnp.float32)   # erosion
            miss_c = jnp.max(x + km, axis=-1, keepdims=True).astype(jnp.float32)  # dilation
            diff_cols.append(hit_c - miss_c)
            hit_cols.append(hit_c)
            miss_cols.append(miss_c)
        cols = diff_cols + hit_cols + miss_cols              # 3*C (n_tile, 1) columns, in vregs
        pad = out_lanes - 3 * c_out
        if pad:
            cols.append(jnp.zeros((n_rows, pad), jnp.float32))
        # single lane-dense store per tile (replaces 3*C masked single-lane stores)
        out_ref[...] = jnp.concatenate(cols, axis=-1).astype(out_ref.dtype)

    return kernel


def morph_encoder_forward(x_nchw, k_hit, k_miss, *, compute_dtype=None, n_tile_max: int = 1024):
    """MorphEncoder.forward: returns (embedding (N,C), hit (N,C,1,1), miss (N,C,1,1))."""
    N, Cin, H, W = x_nchw.shape
    Cout = k_hit.shape[0]
    P = Cin * H * W
    if compute_dtype is None:
        compute_dtype = _default_compute_dtype()
    out_lanes = max(128, _round_up(3 * Cout, 128))           # lane-dense output slab width

    # Batch tiling: sublane-aligned, and for batches >= 32 guarantee >= 4 grid steps so the
    # "parallel" axis can shard across v7x's two TensorCores and the pipeline can overlap DMA.
    N8 = _round_up(max(N, 1), 8)
    n_tile = min(n_tile_max, N8)
    if N8 >= 32:
        n_tile = min(n_tile, max(8, (N8 // 4) // 8 * 8))
    N_pad = _round_up(N8, n_tile)

    x2 = x_nchw.reshape(N, P).astype(compute_dtype)
    if N_pad != N:
        x2 = jnp.pad(x2, ((0, N_pad - N), (0, 0)))           # batch-only pad; no lane pad
    kh2 = k_hit.reshape(Cout, P).astype(compute_dtype)
    km2 = k_miss.reshape(Cout, P).astype(compute_dtype)

    elem_bytes = jnp.dtype(compute_dtype).itemsize
    cost = pl.CostEstimate(
        flops=4 * N_pad * Cout * P,
        transcendentals=0,
        bytes_accessed=N_pad * P * elem_bytes + 2 * Cout * P * elem_bytes + N_pad * out_lanes * 4,
    )

    slab = pl.pallas_call(
        _make_hitmiss_kernel(Cout, out_lanes),
        out_shape=jax.ShapeDtypeStruct((N_pad, out_lanes), jnp.float32),
        grid=(N_pad // n_tile,),
        in_specs=[
            pl.BlockSpec((n_tile, P), lambda i: (i, 0)),     # batch-tiled images (full last dim)
            pl.BlockSpec((Cout, P), lambda i: (0, 0)),       # SEs stay VMEM-resident
            pl.BlockSpec((Cout, P), lambda i: (0, 0)),
        ],
        out_specs=pl.BlockSpec((n_tile, out_lanes), lambda i: (i, 0)),
        compiler_params=pltpu.CompilerParams(
            dimension_semantics=("parallel",),               # independent batch tiles (2 TCs on v7x)
            vmem_limit_bytes=32 * 1024 * 1024,
        ),
        cost_estimate=cost,
    )(x2, kh2, km2)

    embedding = slab[:N, :Cout]                              # Flatten((N,C,1,1)) == (N,C)
    hit = slab[:N, Cout:2 * Cout].reshape(N, Cout, 1, 1)
    miss = slab[:N, 2 * Cout:3 * Cout].reshape(N, Cout, 1, 1)
    return embedding, hit, miss


def _reference(x_nchw, k_hit, k_miss):
    """Plain-JAX f32 reference for sanity checking."""
    N, Cin, H, W = x_nchw.shape
    Cout = k_hit.shape[0]
    P = Cin * H * W
    x2 = x_nchw.reshape(N, P).astype(jnp.float32)
    kh2 = k_hit.reshape(Cout, P).astype(jnp.float32)
    km2 = k_miss.reshape(Cout, P).astype(jnp.float32)
    hit = jnp.min(x2[:, None, :] - kh2[None, :, :], axis=-1)
    miss = jnp.max(x2[:, None, :] + km2[None, :, :], axis=-1)
    return hit - miss, hit, miss


if __name__ == "__main__":
    key = jax.random.PRNGKey(0)
    k_x, k_hit_key, k_miss_key = jax.random.split(key, 3)

    # MorphEncoder() -> MorphNet() -> MNN(in=1, out=10, kernel=28): input is (N, 1, 28, 28)
    N, Cin, Cout, HW = 2, 1, 10, 28
    x = jax.random.uniform(k_x, (N, Cin, HW, HW), dtype=jnp.float32)
    K_hit = 0.1 * jax.random.normal(k_hit_key, (Cout, Cin, HW, HW), jnp.float32)
    K_miss = 0.1 * jax.random.normal(k_miss_key, (Cout, Cin, HW, HW), jnp.float32)

    ref_out, ref_hit, ref_miss = _reference(x, K_hit, K_miss)

    # 1) f32 path: bit-parity with the PyTorch module.
    emb32, hit32, miss32 = morph_encoder_forward(x, K_hit, K_miss, compute_dtype=jnp.float32)
    jax.block_until_ready((emb32, hit32, miss32))
    assert emb32.shape == (N, Cout)
    assert hit32.shape == (N, Cout, 1, 1) and miss32.shape == (N, Cout, 1, 1)
    assert jnp.allclose(emb32, ref_out, atol=1e-5)
    assert jnp.allclose(hit32.reshape(N, Cout), ref_hit, atol=1e-5)
    assert jnp.allclose(miss32.reshape(N, Cout), ref_miss, atol=1e-5)

    # 2) default (chip-dependent) path: bf16 compute on v6e/v7x, f32 elsewhere.
    compute_dtype = _default_compute_dtype()
    embedding, hit, miss = morph_encoder_forward(x, K_hit, K_miss, compute_dtype=compute_dtype)
    jax.block_until_ready((embedding, hit, miss))
    atol = 1e-5 if jnp.dtype(compute_dtype) == jnp.dtype(jnp.float32) else 5e-2
    assert embedding.shape == (N, Cout)
    assert hit.shape == (N, Cout, 1, 1) and miss.shape == (N, Cout, 1, 1)
    assert jnp.allclose(embedding, ref_out, atol=atol)
    assert jnp.allclose(hit.reshape(N, Cout), ref_hit, atol=atol)
    assert jnp.allclose(miss.reshape(N, Cout), ref_miss, atol=atol)

    print("KERNEL_OK")
</pallas_src>

<mosaic_0001>
module attributes {stable_mosaic.version = 11 : i64} {
  func.func @kernel(%arg0: i32, %arg1: memref<8x784xf32, #tpu.memory_space<vmem>>, %arg2: memref<10x784xf32, #tpu.memory_space<vmem>>, %arg3: memref<10x784xf32, #tpu.memory_space<vmem>>, %arg4: memref<8x128xf32, #tpu.memory_space<vmem>>) attributes {dimension_semantics = [#tpu.dimension_semantics<parallel>], iteration_bounds = array<i64: 1>, scalar_prefetch = 0 : i64, scratch_operands = 0 : i64, tpu.core_type = #tpu.core_type<tc>, window_params = [{transform_indices = @transform_0, window_bounds = array<i64: 8, 784>}, {pipeline_mode = #tpu.pipeline_mode<synchronous>, transform_indices = @transform_1, window_bounds = array<i64: 10, 784>}, {pipeline_mode = #tpu.pipeline_mode<synchronous>, transform_indices = @transform_2, window_bounds = array<i64: 10, 784>}, {transform_indices = @transform_3, window_bounds = array<i64: 8, 128>}]} {
    %c0 = arith.constant 0 : index
    %c0_0 = arith.constant 0 : index
    %0 = vector.load %arg1[%c0, %c0_0] : memref<8x784xf32, #tpu.memory_space<vmem>>, vector<8x784xf32>
    %c0_1 = arith.constant 0 : index
    %c0_2 = arith.constant 0 : index
    %1 = vector.load %arg2[%c0_1, %c0_2] : memref<10x784xf32, #tpu.memory_space<vmem>>, vector<1x784xf32>
    %c0_3 = arith.constant 0 : index
    %c0_4 = arith.constant 0 : index
    %2 = vector.load %arg3[%c0_3, %c0_4] : memref<10x784xf32, #tpu.memory_space<vmem>>, vector<1x784xf32>
    %3 = vector.broadcast %1 : vector<1x784xf32> to vector<8x784xf32>
    %4 = arith.subf %0, %3 : vector<8x784xf32>
    %cst = arith.constant dense<0x7F800000> : vector<8xf32>
    %5 = vector.multi_reduction <minimumf>, %4, %cst [1] : vector<8x784xf32> to vector<8xf32>
    %6 = vector.shape_cast %5 : vector<8xf32> to vector<8x1xf32>
    %7 = vector.broadcast %2 : vector<1x784xf32> to vector<8x784xf32>
    %8 = arith.addf %0, %7 : vector<8x784xf32>
    %cst_5 = arith.constant dense<0xFF800000> : vector<8xf32>
    %9 = vector.multi_reduction <maximumf>, %8, %cst_5 [1] : vector<8x784xf32> to vector<8xf32>
    %10 = vector.shape_cast %9 : vector<8xf32> to vector<8x1xf32>
    %11 = arith.subf %6, %10 : vector<8x1xf32>
    %c1 = arith.constant 1 : index
    %c0_6 = arith.constant 0 : index
    %12 = vector.load %arg2[%c1, %c0_6] : memref<10x784xf32, #tpu.memory_space<vmem>>, vector<1x784xf32>
    %c1_7 = arith.constant 1 : index
    %c0_8 = arith.constant 0 : index
    %13 = vector.load %arg3[%c1_7, %c0_8] : memref<10x784xf32, #tpu.memory_space<vmem>>, vector<1x784xf32>
    %14 = vector.broadcast %12 : vector<1x784xf32> to vector<8x784xf32>
    %15 = arith.subf %0, %14 : vector<8x784xf32>
    %cst_9 = arith.constant dense<0x7F800000> : vector<8xf32>
    %16 = vector.multi_reduction <minimumf>, %15, %cst_9 [1] : vector<8x784xf32> to vector<8xf32>
    %17 = vector.shape_cast %16 : vector<8xf32> to vector<8x1xf32>
    %18 = vector.broadcast %13 : vector<1x784xf32> to vector<8x784xf32>
    %19 = arith.addf %0, %18 : vector<8x784xf32>
    %cst_10 = arith.constant dense<0xFF800000> : vector<8xf32>
    %20 = vector.multi_reduction <maximumf>, %19, %cst_10 [1] : vector<8x784xf32> to vector<8xf32>
    %21 = vector.shape_cast %20 : vector<8xf32> to vector<8x1xf32>
    %22 = arith.subf %17, %21 : vector<8x1xf32>
    %c2 = arith.constant 2 : index
    %c0_11 = arith.constant 0 : index
    %23 = vector.load %arg2[%c2, %c0_11] : memref<10x784xf32, #tpu.memory_space<vmem>>, vector<1x784xf32>
    %c2_12 = arith.constant 2 : index
    %c0_13 = arith.constant 0 : index
    %24 = vector.load %arg3[%c2_12, %c0_13] : memref<10x784xf32, #tpu.memory_space<vmem>>, vector<1x784xf32>
    %25 = vector.broadcast %23 : vector<1x784xf32> to vector<8x784xf32>
    %26 = arith.subf %0, %25 : vector<8x784xf32>
    %cst_14 = arith.constant dense<0x7F800000> : vector<8xf32>
    %27 = vector.multi_reduction <minimumf>, %26, %cst_14 [1] : vector<8x784xf32> to vector<8xf32>
    %28 = vector.shape_cast %27 : vector<8xf32> to vector<8x1xf32>
    %29 = vector.broadcast %24 : vector<1x784xf32> to vector<8x784xf32>
    %30 = arith.addf %0, %29 : vector<8x784xf32>
    %cst_15 = arith.constant dense<0xFF800000> : vector<8xf32>
    %31 = vector.multi_reduction <maximumf>, %30, %cst_15 [1] : vector<8x784xf32> to vector<8xf32>
    %32 = vector.shape_cast %31 : vector<8xf32> to vector<8x1xf32>
    %33 = arith.subf %28, %32 : vector<8x1xf32>
    %c3 = arith.constant 3 : index
    %c0_16 = arith.constant 0 : index
    %34 = vector.load %arg2[%c3, %c0_16] : memref<10x784xf32, #tpu.memory_space<vmem>>, vector<1x784xf32>
    %c3_17 = arith.constant 3 : index
    %c0_18 = arith.constant 0 : index
    %35 = vector.load %arg3[%c3_17, %c0_18] : memref<10x784xf32, #tpu.memory_space<vmem>>, vector<1x784xf32>
    %36 = vector.broadcast %34 : vector<1x784xf32> to vector<8x784xf32>
    %37 = arith.subf %0, %36 : vector<8x784xf32>
    %cst_19 = arith.constant dense<0x7F800000> : vector<8xf32>
    %38 = vector.multi_reduction <minimumf>, %37, %cst_19 [1] : vector<8x784xf32> to vector<8xf32>
    %39 = vector.shape_cast %38 : vector<8xf32> to vector<8x1xf32>
    %40 = vector.broadcast %35 : vector<1x784xf32> to vector<8x784xf32>
    %41 = arith.addf %0, %40 : vector<8x784xf32>
    %cst_20 = arith.constant dense<0xFF800000> : vector<8xf32>
    %42 = vector.multi_reduction <maximumf>, %41, %cst_20 [1] : vector<8x784xf32> to vector<8xf32>
    %43 = vector.shape_cast %42 : vector<8xf32> to vector<8x1xf32>
    %44 = arith.subf %39, %43 : vector<8x1xf32>
    %c4 = arith.constant 4 : index
    %c0_21 = arith.constant 0 : index
    %45 = vector.load %arg2[%c4, %c0_21] : memref<10x784xf32, #tpu.memory_space<vmem>>, vector<1x784xf32>
    %c4_22 = arith.constant 4 : index
    %c0_23 = arith.constant 0 : index
    %46 = vector.load %arg3[%c4_22, %c0_23] : memref<10x784xf32, #tpu.memory_space<vmem>>, vector<1x784xf32>
    %47 = vector.broadcast %45 : vector<1x784xf32> to vector<8x784xf32>
    %48 = arith.subf %0, %47 : vector<8x784xf32>
    %cst_24 = arith.constant dense<0x7F800000> : vector<8xf32>
    %49 = vector.multi_reduction <minimumf>, %48, %cst_24 [1] : vector<8x784xf32> to vector<8xf32>
    %50 = vector.shape_cast %49 : vector<8xf32> to vector<8x1xf32>
    %51 = vector.broadcast %46 : vector<1x784xf32> to vector<8x784xf32>
    %52 = arith.addf %0, %51 : vector<8x784xf32>
    %cst_25 = arith.constant dense<0xFF800000> : vector<8xf32>
    %53 = vector.multi_reduction <maximumf>, %52, %cst_25 [1] : vector<8x784xf32> to vector<8xf32>
    %54 = vector.shape_cast %53 : vector<8xf32> to vector<8x1xf32>
    %55 = arith.subf %50, %54 : vector<8x1xf32>
    %c5 = arith.constant 5 : index
    %c0_26 = arith.constant 0 : index
    %56 = vector.load %arg2[%c5, %c0_26] : memref<10x784xf32, #tpu.memory_space<vmem>>, vector<1x784xf32>
    %c5_27 = arith.constant 5 : index
    %c0_28 = arith.constant 0 : index
    %57 = vector.load %arg3[%c5_27, %c0_28] : memref<10x784xf32, #tpu.memory_space<vmem>>, vector<1x784xf32>
    %58 = vector.broadcast %56 : vector<1x784xf32> to vector<8x784xf32>
    %59 = arith.subf %0, %58 : vector<8x784xf32>
    %cst_29 = arith.constant dense<0x7F800000> : vector<8xf32>
    %60 = vector.multi_reduction <minimumf>, %59, %cst_29 [1] : vector<8x784xf32> to vector<8xf32>
    %61 = vector.shape_cast %60 : vector<8xf32> to vector<8x1xf32>
    %62 = vector.broadcast %57 : vector<1x784xf32> to vector<8x784xf32>
    %63 = arith.addf %0, %62 : vector<8x784xf32>
    %cst_30 = arith.constant dense<0xFF800000> : vector<8xf32>
    %64 = vector.multi_reduction <maximumf>, %63, %cst_30 [1] : vector<8x784xf32> to vector<8xf32>
    %65 = vector.shape_cast %64 : vector<8xf32> to vector<8x1xf32>
    %66 = arith.subf %61, %65 : vector<8x1xf32>
    %c6 = arith.constant 6 : index
    %c0_31 = arith.constant 0 : index
    %67 = vector.load %arg2[%c6, %c0_31] : memref<10x784xf32, #tpu.memory_space<vmem>>, vector<1x784xf32>
    %c6_32 = arith.constant 6 : index
    %c0_33 = arith.constant 0 : index
    %68 = vector.load %arg3[%c6_32, %c0_33] : memref<10x784xf32, #tpu.memory_space<vmem>>, vector<1x784xf32>
    %69 = vector.broadcast %67 : vector<1x784xf32> to vector<8x784xf32>
    %70 = arith.subf %0, %69 : vector<8x784xf32>
    %cst_34 = arith.constant dense<0x7F800000> : vector<8xf32>
    %71 = vector.multi_reduction <minimumf>, %70, %cst_34 [1] : vector<8x784xf32> to vector<8xf32>
    %72 = vector.shape_cast %71 : vector<8xf32> to vector<8x1xf32>
    %73 = vector.broadcast %68 : vector<1x784xf32> to vector<8x784xf32>
    %74 = arith.addf %0, %73 : vector<8x784xf32>
    %cst_35 = arith.constant dense<0xFF800000> : vector<8xf32>
    %75 = vector.multi_reduction <maximumf>, %74, %cst_35 [1] : vector<8x784xf32> to vector<8xf32>
    %76 = vector.shape_cast %75 : vector<8xf32> to vector<8x1xf32>
    %77 = arith.subf %72, %76 : vector<8x1xf32>
    %c7 = arith.constant 7 : index
    %c0_36 = arith.constant 0 : index
    %78 = vector.load %arg2[%c7, %c0_36] : memref<10x784xf32, #tpu.memory_space<vmem>>, vector<1x784xf32>
    %c7_37 = arith.constant 7 : index
    %c0_38 = arith.constant 0 : index
    %79 = vector.load %arg3[%c7_37, %c0_38] : memref<10x784xf32, #tpu.memory_space<vmem>>, vector<1x784xf32>
    %80 = vector.broadcast %78 : vector<1x784xf32> to vector<8x784xf32>
    %81 = arith.subf %0, %80 : vector<8x784xf32>
    %cst_39 = arith.constant dense<0x7F800000> : vector<8xf32>
    %82 = vector.multi_reduction <minimumf>, %81, %cst_39 [1] : vector<8x784xf32> to vector<8xf32>
    %83 = vector.shape_cast %82 : vector<8xf32> to vector<8x1xf32>
    %84 = vector.broadcast %79 : vector<1x784xf32> to vector<8x784xf32>
    %85 = arith.addf %0, %84 : vector<8x784xf32>
    %cst_40 = arith.constant dense<0xFF800000> : vector<8xf32>
    %86 = vector.multi_reduction <maximumf>, %85, %cst_40 [1] : vector<8x784xf32> to vector<8xf32>
    %87 = vector.shape_cast %86 : vector<8xf32> to vector<8x1xf32>
    %88 = arith.subf %83, %87 : vector<8x1xf32>
    %c8 = arith.constant 8 : index
    %c0_41 = arith.constant 0 : index
    %89 = vector.load %arg2[%c8, %c0_41] : memref<10x784xf32, #tpu.memory_space<vmem>>, vector<1x784xf32>
    %c8_42 = arith.constant 8 : index
    %c0_43 = arith.constant 0 : index
    %90 = vector.load %arg3[%c8_42, %c0_43] : memref<10x784xf32, #tpu.memory_space<vmem>>, vector<1x784xf32>
    %91 = vector.broadcast %89 : vector<1x784xf32> to vector<8x784xf32>
    %92 = arith.subf %0, %91 : vector<8x784xf32>
    %cst_44 = arith.constant dense<0x7F800000> : vector<8xf32>
    %93 = vector.multi_reduction <minimumf>, %92, %cst_44 [1] : vector<8x784xf32> to vector<8xf32>
    %94 = vector.shape_cast %93 : vector<8xf32> to vector<8x1xf32>
    %95 = vector.broadcast %90 : vector<1x784xf32> to vector<8x784xf32>
    %96 = arith.addf %0, %95 : vector<8x784xf32>
    %cst_45 = arith.constant dense<0xFF800000> : vector<8xf32>
    %97 = vector.multi_reduction <maximumf>, %96, %cst_45 [1] : vector<8x784xf32> to vector<8xf32>
    %98 = vector.shape_cast %97 : vector<8xf32> to vector<8x1xf32>
    %99 = arith.subf %94, %98 : vector<8x1xf32>
    %c9 = arith.constant 9 : index
    %c0_46 = arith.constant 0 : index
    %100 = vector.load %arg2[%c9, %c0_46] : memref<10x784xf32, #tpu.memory_space<vmem>>, vector<1x784xf32>
    %c9_47 = arith.constant 9 : index
    %c0_48 = arith.constant 0 : index
    %101 = vector.load %arg3[%c9_47, %c0_48] : memref<10x784xf32, #tpu.memory_space<vmem>>, vector<1x784xf32>
    %102 = vector.broadcast %100 : vector<1x784xf32> to vector<8x784xf32>
    %103 = arith.subf %0, %102 : vector<8x784xf32>
    %cst_49 = arith.constant dense<0x7F800000> : vector<8xf32>
    %104 = vector.multi_reduction <minimumf>, %103, %cst_49 [1] : vector<8x784xf32> to vector<8xf32>
    %105 = vector.shape_cast %104 : vector<8xf32> to vector<8x1xf32>
    %106 = vector.broadcast %101 : vector<1x784xf32> to vector<8x784xf32>
    %107 = arith.addf %0, %106 : vector<8x784xf32>
    %cst_50 = arith.constant dense<0xFF800000> : vector<8xf32>
    %108 = vector.multi_reduction <maximumf>, %107, %cst_50 [1] : vector<8x784xf32> to vector<8xf32>
    %109 = vector.shape_cast %108 : vector<8xf32> to vector<8x1xf32>
    %110 = arith.subf %105, %109 : vector<8x1xf32>
    %cst_51 = arith.constant 0.000000e+00 : f32
    %111 = vector.broadcast %cst_51 : f32 to vector<8x98xf32>
    %112 = tpu.concatenate %11, %22, %33, %44, %55, %66, %77, %88, %99, %110, %6, %17, %28, %39, %50, %61 in 1 : vector<8x1xf32>, vector<8x1xf32>, vector<8x1xf32>, vector<8x1xf32>, vector<8x1xf32>, vector<8x1xf32>, vector<8x1xf32>, vector<8x1xf32>, vector<8x1xf32>, vector<8x1xf32>, vector<8x1xf32>, vector<8x1xf32>, vector<8x1xf32>, vector<8x1xf32>, vector<8x1xf32>, vector<8x1xf32> -> vector<8x16xf32>
    %113 = tpu.concatenate %72, %83, %94, %105, %10, %21, %32, %43, %54, %65, %76, %87, %98, %109, %111 in 1 : vector<8x1xf32>, vector<8x1xf32>, vector<8x1xf32>, vector<8x1xf32>, vector<8x1xf32>, vector<8x1xf32>, vector<8x1xf32>, vector<8x1xf32>, vector<8x1xf32>, vector<8x1xf32>, vector<8x1xf32>, vector<8x1xf32>, vector<8x1xf32>, vector<8x1xf32>, vector<8x98xf32> -> vector<8x112xf32>
    %114 = tpu.concatenate %112, %113 in 1 : vector<8x16xf32>, vector<8x112xf32> -> vector<8x128xf32>
    %c0_52 = arith.constant 0 : index
    %c0_53 = arith.constant 0 : index
    %115 = vector.load %arg4[%c0_52, %c0_53] : memref<8x128xf32, #tpu.memory_space<vmem>>, vector<8x128xf32>
    tpu.vector_store %arg4[%c0_52, %c0_53], %114 {strides = array<i32>} : memref<8x128xf32, #tpu.memory_space<vmem>>, vector<8x128xf32>,
    return
  }
  func.func @transform_0(%arg0: i32) -> (i32, i32) {
    %c0_i32 = arith.constant 0 : i32
    %c0_i32_0 = arith.constant 0 : i32
    return %arg0, %c0_i32 : i32, i32
  }
  func.func @transform_1(%arg0: i32) -> (i32, i32) {
    %c0_i32 = arith.constant 0 : i32
    %c0_i32_0 = arith.constant 0 : i32
    %c0_i32_1 = arith.constant 0 : i32
    return %c0_i32, %c0_i32_0 : i32, i32
  }
  func.func @transform_2(%arg0: i32) -> (i32, i32) {
    %c0_i32 = arith.constant 0 : i32
    %c0_i32_0 = arith.constant 0 : i32
    %c0_i32_1 = arith.constant 0 : i32
    return %c0_i32, %c0_i32_0 : i32, i32
  }
  func.func @transform_3(%arg0: i32) -> (i32, i32) {
    %c0_i32 = arith.constant 0 : i32
    %c0_i32_0 = arith.constant 0 : i32
    return %arg0, %c0_i32 : i32, i32
  }
}

</mosaic_0001>

<bundles_post_ra>
// kernel: tpu_custom_call.1
= control target key start
LH: loop header
LB: loop body
LE: loop exit
PB: predicated region body
PF: predicated region fallthrough
CT: control target
= control target key end

     0   :  { %8 = vsyncpa [#allocation3], 0  ;;  %s1833_s0 = inlined_call_operand.hbm [shape: f32[8,784], index: 0, kind: input, shape index: {}]   ;;  %s1834_s1 = inlined_call_operand.hbm [shape: f32[10,784], index: 1, kind: input, shape index: {}]   ;;  %s1835_s2 = inlined_call_operand.hbm [shape: f32[10,784], index: 2, kind: input, shape index: {}]   ;;  %s1836_s3 = inlined_call_operand.hbm [shape: f32[8,128], index: 3, kind: output, shape index: {}]  }
   0x1   :  { %9 = vsyncpa [#allocation6], 0 }
   0x2   :  { %10 = vsyncpa [#allocation4], 0  ;;  %s1349_s12 = smov [#allocation5]  }
   0x3   :  { %s26_s13 = sshll.u32 %s1349_s12, 4  ;;  %s27_s13 = int_to_ptr.vmem [resolvable:$true] %s26_s13 }
   0x4   :  { %s1271_s14 = scalar_lea.vmem %s27_s13, 1792  ;;  %p1276_p1 = scmp.lt.s32.totalorder %s27_s13, %s27_s13 }
   0x5   :  { %p1272_p0 = scmp.ne.s32.totalorder %s27_s13, %s1271_s14  ;;  %p1277_p2 = scmp.lt.s32.totalorder %s1271_s14, %s1271_s14 }
   0x7   :  { %p1278_p3 = por %p1277_p2, %p1276_p1 }
   0x9   :  { %p1279_p4 = pnand %p1278_p3, %p1272_p0 }
   0xb   :  { %1282 = shalt.err (!%p1279_p4)
}
   0xc   :  { %s1350_s15 = smov 896   ;;  %s1351_s16 = smov 56  }
   0xd   :  { %32 = dma.hbm_to_vmem [thread:$0]  %s1834_s1, 1792, %s27_s13, [#allocation6], %s1350_s15, %s1350_s15, %s1351_s16  }
   0xe   :  { %s1352_s19 = smov [#allocation2]   ;;  %s1353_s21 = smov [#allocation7]  }
   0xf   :  { %s17_s20 = sshll.u32 %s1352_s19, 4  ;;  %s38_s22 = sshll.u32 %s1353_s21, 4  ;;  %s18_s20 = int_to_ptr.vmem [resolvable:$true] %s17_s20  ;;  %s39_s22 = int_to_ptr.vmem [resolvable:$true] %s38_s22 }
  0x10   :  { %s1291_s23 = scalar_lea.vmem %s18_s20, 896  ;;  %p1296_p6 = scmp.lt.s32.totalorder %s18_s20, %s18_s20 }
  0x11   :  { %p1292_p5 = scmp.ne.s32.totalorder %s18_s20, %s1291_s23  ;;  %p1297_p7 = scmp.lt.s32.totalorder %s1291_s23, %s1291_s23 }
  0x13   :  { %p1298_p8 = por %p1297_p7, %p1296_p6 }
  0x15   :  { %p1299_p9 = pnand %p1298_p8, %p1292_p5 }
  0x17   :  { %1302 = shalt.err (!%p1299_p9)
}
  0x18   :  { %20 = dma.hbm_to_vmem [thread:$0]  %s1833_s0, 896, %s18_s20, [#allocation3]  }
  0x19   :  { %s1311_s26 = scalar_lea.vmem %s39_s22, 1792  ;;  %p1316_p11 = scmp.lt.s32.totalorder %s39_s22, %s39_s22 }
  0x1a   :  { %p1312_p10 = scmp.ne.s32.totalorder %s39_s22, %s1311_s26  ;;  %p1317_p12 = scmp.lt.s32.totalorder %s1311_s26, %s1311_s26 }
  0x1c   :  { %p1318_p13 = por %p1317_p12, %p1316_p11 }
  0x1e   :  { %p1319_p0 = pnand %p1318_p13, %p1312_p10 }
  0x20   :  { %1322 = shalt.err (!%p1319_p0)
}
  0x21   :  { %44 = dma.hbm_to_vmem [thread:$0]  %s1835_s2, 1792, %s39_s22, [#allocation6], %s1350_s15, %s1350_s15, %s1351_s16  }
  0x22   :  { %1343 = dma.done.wait [#allocation3], 896  }
  0x23   :  { %1344 = vsyncadd [#allocation3], 4294966400 }
  0x24   :  { %1345 = dma.done.wait [#allocation6], 3584  }
  0x25   :  { %1346 = vsyncadd [#allocation6], 4294963712  ;;  %v68_v0 = vlaneseq  ;;  %v965_v9 = vld [vmem:[#allocation5 + $0x38] ss:$8 sm:$0xf]  ;;  %vm112_vm0 = vcmask 130048  }
  0x26   :  { %v966_v10 = vld [vmem:[#allocation5 + $0x38] ss:$8 sm:$0x70]  ;;  %v739_v11 = vld [vmem:[#allocation5 + $0x6] ss:$8 sm:$0xf] }
  0x27   :  { %v69_v1 = vshrl.u32 %v68_v0, 7  ;;  %v1399_v12 = vld [vmem:[#allocation2] sm:$0xff]  ;;  %v967_v13 = vor.u32 %v966_v10, %v965_v9  ;;  %v1401_v15 = vld [vmem:[#allocation2 + $0x8] sm:$0xff]  ;;  %v1403_v16 = vld [vmem:[#allocation2 + $0x10] sm:$0xff]  ;;  %vm1190_vm1 = vcmask 7168   ;;  %vm1192_vm2 = vcmask 15360  }
  0x28   :  { %v740_v14 = vld [vmem:[#allocation5 + $0x6] ss:$8 sm:$0x70]  ;;  %v1411_v21 = vld [vmem:[#allocation2 + $0x30] sm:$0xff]  ;;  %vm1194_vm3 = vcmask 23552   ;;  %vm1196_vm4 = vcmask 31744  }
  0x29   :  { %v1385_v2 = vsub.s32 0, %v69_v1  ;;  %v1387_v3 = vsub.s32 1, %v69_v1  ;;  %v1389_v4 = vsub.s32 2, %v69_v1  ;;  %v1391_v5 = vsub.s32 3, %v69_v1  ;;  %v1405_v17 = vld [vmem:[#allocation2 + $0x18] sm:$0xff]  ;;  %v1407_v19 = vld [vmem:[#allocation2 + $0x20] sm:$0xff] }
  0x2a   :  { %v1393_v6 = vsub.s32 4, %v69_v1  ;;  %v1395_v7 = vsub.s32 5, %v69_v1  ;;  %v1397_v8 = vsub.s32 6, %v69_v1  ;;  %v741_v18 = vor.u32 %v740_v14, %v739_v11  ;;  %v1409_v20 = vld [vmem:[#allocation2 + $0x28] sm:$0xff]  ;;  %s1354_s0 = smov 16   ;;  %s1355_s2 = smov [#allocation8]  }
  0x2b   :  { %v976_v22 = vrot.slane %v967_v13, %v1385_v2  ;;  %v980_v23 = vrot.slane %v967_v13, %v1387_v3  ;;  %v984_v24 = vrot.slane %v967_v13, %v1389_v4  ;;  %v988_v25 = vrot.slane %v967_v13, %v1391_v5  ;;  %v1078_v38 = vld [vmem:[#allocation5 + $0x39] ss:$8 sm:$0xf]  ;;  %v852_v40 = vld [vmem:[#allocation5 + $0x7] ss:$8 sm:$0xf] }
  0x2c   :  { %v992_v26 = vrot.slane %v967_v13, %v1393_v6  ;;  %v996_v27 = vrot.slane %v967_v13, %v1395_v7  ;;  %v1000_v28 = vrot.slane %v967_v13, %v1397_v8  ;;  %v750_v29 = vrot.slane %v741_v18, %v1385_v2  ;;  %v1079_v39 = vld [vmem:[#allocation5 + $0x39] ss:$8 sm:$0x70]  ;;  %v853_v45 = vld [vmem:[#allocation5 + $0x7] ss:$8 sm:$0x70] }
  0x2d   :  { %v1008_v30 = vsub.f32 %v1399_v12, %v976_v22  ;;  %v1009_v31 = vsub.f32 %v1401_v15, %v980_v23  ;;  %v1010_v32 = vsub.f32 %v1403_v16, %v984_v24  ;;  %v1011_v33 = vsub.f32 %v1405_v17, %v988_v25  ;;  %v178_v46 = vld [vmem:[#allocation7 + $0x1] ss:$8 sm:$0xf]  ;;  %v64_v56 = vld [vmem:[#allocation7] ss:$8 sm:$0xf] }
  0x2e   :  { %v1012_v34 = vsub.f32 %v1407_v19, %v992_v26  ;;  %v1013_v35 = vsub.f32 %v1409_v20, %v996_v27  ;;  %v1014_v36 = vsub.f32 %v1411_v21, %v1000_v28  ;;  %v754_v37 = vrot.slane %v741_v18, %v1387_v3  ;;  %v179_v51 = vld [vmem:[#allocation7 + $0x1] ss:$8 sm:$0x70]  ;;  %v65_v57 = vld [vmem:[#allocation7] ss:$8 sm:$0x70] }
  0x2f   :  { %v758_v41 = vrot.slane %v741_v18, %v1389_v4  ;;  %v762_v42 = vrot.slane %v741_v18, %v1391_v5  ;;  %v766_v43 = vrot.slane %v741_v18, %v1393_v6  ;;  %v770_v44 = vrot.slane %v741_v18, %v1395_v7  ;;  %s1246_s28 = sshll.u32 %s1355_s2, 4  ;;  %s1247_s28 = int_to_ptr.vmem [resolvable:$true] %s1246_s28 }
  0x30   :  { %v1015_v47 = vmin.f32 %v1008_v30, %v1012_v34  ;;  %v1016_v48 = vmin.f32 %v1009_v31, %v1013_v35  ;;  %v1017_v49 = vsel %vm112_vm0, %v1014_v36, inf  ;;  %v774_v50 = vrot.slane %v741_v18, %v1397_v8  ;;  %s1323_s29 = scalar_lea.vmem %s1247_s28, 128  ;;  %p1328_p2 = scmp.lt.s32.totalorder %s1247_s28, %s1247_s28 }
  0x31   :  { %v1018_v52 = vmin.f32 %v1010_v32, %v1017_v49  ;;  %v782_v53 = vsub.f32 %v1399_v12, %v750_v29  ;;  %v783_v54 = vsub.f32 %v1401_v15, %v754_v37  ;;  %v784_v55 = vsub.f32 %v1403_v16, %v758_v41  ;;  %p1324_p1 = scmp.ne.s32.totalorder %s1247_s28, %s1323_s29  ;;  %p1329_p3 = scmp.lt.s32.totalorder %s1323_s29, %s1323_s29 }
  0x32   :  { %v1019_v58 = vmin.f32 %v1015_v47, %v1016_v48  ;;  %v785_v59 = vsub.f32 %v1405_v17, %v762_v42  ;;  %v786_v60 = vsub.f32 %v1407_v19, %v766_v43  ;;  %v787_v61 = vsub.f32 %v1409_v20, %v770_v44 }
  0x33   :  { %v1020_v62 = vmin.f32 %v1018_v52, %v1011_v33  ;;  %v788_v63 = vsub.f32 %v1411_v21, %v774_v50  ;;  %v1080_v0 = vor.u32 %v1079_v39, %v1078_v38  ;;  %v854_v1 = vor.u32 %v853_v45, %v852_v40  ;;  %p1330_p4 = por %p1329_p3, %p1328_p2 }
  0x34   :  { %v789_v9 = vmin.f32 %v782_v53, %v786_v60  ;;  %v790_v10 = vmin.f32 %v783_v54, %v787_v61  ;;  %v1442_v11 = vor.u32 %v179_v51, %v178_v46  ;;  %v1444_v13 = vor.u32 %v65_v57, %v64_v56 }
  0x35   :  { %v1021_v14 = vmin.f32 %v1019_v58, %v1020_v62  ;;  %v791_v18 = vsel %vm112_vm0, %v788_v63, inf  ;;  %v1089_v22 = vrot.slane %v1080_v0, %v1385_v2  ;;  %v1093_v23 = vrot.slane %v1080_v0, %v1387_v3  ;;  %p1331_p5 = pnand %p1330_p4, %p1324_p1 }
  0x36   :  { %v792_v24 = vmin.f32 %v784_v55, %v791_v18  ;;  %v793_v25 = vmin.f32 %v789_v9, %v790_v10  ;;  %v1097_v26 = vrot.slane %v1080_v0, %v1389_v4  ;;  %v1101_v27 = vrot.slane %v1080_v0, %v1391_v5 }
  0x37   :  { %1022 = vmin.xlane.f32.xlu1 %v1021_v14  ;;  %v1105_v28 = vrot.slane %v1080_v0, %v1393_v6  ;;  %v1109_v29 = vrot.slane %v1080_v0, %v1395_v7  ;;  %v1113_v30 = vrot.slane %v1080_v0, %v1397_v8  ;;  %v1121_v31 = vsub.f32 %v1399_v12, %v1089_v22 }
  0x38   :  { %v794_v32 = vmin.f32 %v792_v24, %v785_v59  ;;  %v1122_v33 = vsub.f32 %v1401_v15, %v1093_v23  ;;  %v1123_v34 = vsub.f32 %v1403_v16, %v1097_v26  ;;  %v1124_v35 = vsub.f32 %v1405_v17, %v1101_v27 }
  0x39   :  { %v1125_v36 = vsub.f32 %v1407_v19, %v1105_v28  ;;  %v1126_v37 = vsub.f32 %v1409_v20, %v1109_v29  ;;  %v1127_v38 = vsub.f32 %v1411_v21, %v1113_v30  ;;  %v863_v39 = vrot.slane %v854_v1, %v1385_v2 }
  0x3a   :  { %v795_v40 = vmin.f32 %v793_v25, %v794_v32  ;;  %v867_v41 = vrot.slane %v854_v1, %v1387_v3  ;;  %v871_v42 = vrot.slane %v854_v1, %v1389_v4  ;;  %v875_v43 = vrot.slane %v854_v1, %v1391_v5 }
  0x3b   :  { %v1128_v44 = vmin.f32 %v1121_v31, %v1125_v36  ;;  %v1129_v45 = vmin.f32 %v1122_v33, %v1126_v37  ;;  %v1130_v46 = vsel %vm112_vm0, %v1127_v38, inf  ;;  %v879_v47 = vrot.slane %v854_v1, %v1393_v6  ;;  %v405_v36 = vld [vmem:[#allocation7 + $0x3] ss:$8 sm:$0x70] }
  0x3c   :  { %796 = vmin.xlane.f32.xlu0 %v795_v40  ;;  %v1131_v48 = vmin.f32 %v1123_v34, %v1130_v46  ;;  %v883_v49 = vrot.slane %v854_v1, %v1395_v7  ;;  %v887_v50 = vrot.slane %v854_v1, %v1397_v8  ;;  %v895_v51 = vsub.f32 %v1399_v12, %v863_v39  ;;  %v291_v37 = vld [vmem:[#allocation7 + $0x2] ss:$8 sm:$0xf] }
  0x3d   :  { %v1132_v52 = vmin.f32 %v1128_v44, %v1129_v45  ;;  %v896_v53 = vsub.f32 %v1401_v15, %v867_v41  ;;  %v897_v54 = vsub.f32 %v1403_v16, %v871_v42  ;;  %v898_v55 = vsub.f32 %v1405_v17, %v875_v43  ;;  %v292_v42 = vld [vmem:[#allocation7 + $0x2] ss:$8 sm:$0x70]  ;;  %v630_v43 = vld [vmem:[#allocation7 + $0x5] ss:$8 sm:$0xf] }
  0x3e   :  { %v1133_v56 = vmin.f32 %v1131_v48, %v1124_v35  ;;  %v899_v57 = vsub.f32 %v1407_v19, %v879_v47  ;;  %v900_v58 = vsub.f32 %v1409_v20, %v883_v49  ;;  %v901_v59 = vsub.f32 %v1411_v21, %v887_v50  ;;  %v404_v35 = vld [vmem:[#allocation7 + $0x3] ss:$8 sm:$0xf]  ;;  %v631_v48 = vld [vmem:[#allocation7 + $0x5] ss:$8 sm:$0x70] }
  0x3f   :  { %v237_v60 = vrot.slane %v1442_v11, %v1385_v2  ;;  %v241_v61 = vrot.slane %v1442_v11, %v1387_v3  ;;  %v245_v62 = vrot.slane %v1442_v11, %v1389_v4  ;;  %v249_v63 = vrot.slane %v1442_v11, %v1391_v5 }
  0x40   :  { %v1134_v0 = vmin.f32 %v1132_v52, %v1133_v56  ;;  %v902_v1 = vmin.f32 %v895_v51, %v899_v57  ;;  %v903_v9 = vmin.f32 %v896_v53, %v900_v58  ;;  %v904_v10 = vsel %vm112_vm0, %v901_v59, inf  ;;  %v517_v53 = vld [vmem:[#allocation7 + $0x4] ss:$8 sm:$0xf] }
  0x41   :  { %v905_v14 = vmin.f32 %v897_v54, %v904_v10  ;;  %v253_v18 = vrot.slane %v1442_v11, %v1393_v6  ;;  %v257_v22 = vrot.slane %v1442_v11, %v1395_v7  ;;  %v261_v23 = vrot.slane %v1442_v11, %v1397_v8  ;;  %v518_v54 = vld [vmem:[#allocation7 + $0x4] ss:$8 sm:$0x70] }
  0x42   :  { %1135 = vmin.xlane.f32.xlu1 %v1134_v0  ;;  %v906_v24 = vmin.f32 %v902_v1, %v903_v9  ;;  %v269_v25 = vadd.f32 %v237_v60, %v1399_v12  ;;  %v270_v26 = vadd.f32 %v241_v61, %v1401_v15  ;;  %v271_v27 = vadd.f32 %v245_v62, %v1403_v16 }
  0x43   :  { %v907_v28 = vmin.f32 %v905_v14, %v898_v55  ;;  %v272_v29 = vadd.f32 %v249_v63, %v1405_v17  ;;  %v273_v30 = vadd.f32 %v253_v18, %v1407_v19  ;;  %v274_v31 = vadd.f32 %v257_v22, %v1409_v20 }
  0x44   :  { %v275_v32 = vadd.f32 %v261_v23, %v1411_v21  ;;  %v124_v11 = vrot.slane %v1444_v13, %v1385_v2  ;;  %v128_v33 = vrot.slane %v1444_v13, %v1387_v3  ;;  %v132_v34 = vrot.slane %v1444_v13, %v1389_v4 }
  0x45   :  { %v908_v38 = vmin.f32 %v906_v24, %v907_v28  ;;  %v276_v39 = vmax.f32 %v269_v25, %v273_v30  ;;  %v277_v40 = vmax.f32 %v270_v26, %v274_v31  ;;  %v136_v41 = vrot.slane %v1444_v13, %v1391_v5 }
  0x46   :  { %v278_v44 = vsel %vm112_vm0, %v275_v32, -inf  ;;  %v140_v45 = vrot.slane %v1444_v13, %v1393_v6  ;;  %v144_v46 = vrot.slane %v1444_v13, %v1395_v7  ;;  %v148_v47 = vrot.slane %v1444_v13, %v1397_v8 }
  0x47   :  { %909 = vmin.xlane.f32.xlu0 %v908_v38  ;;  %v279_v49 = vmax.f32 %v271_v27, %v278_v44  ;;  %v280_v50 = vmax.f32 %v276_v39, %v277_v40  ;;  %v156_v51 = vadd.f32 %v124_v11, %v1399_v12  ;;  %v157_v52 = vadd.f32 %v128_v33, %v1401_v15 }
  0x48   :  { %v158_v55 = vadd.f32 %v132_v34, %v1403_v16  ;;  %v159_v56 = vadd.f32 %v136_v41, %v1405_v17  ;;  %v160_v57 = vadd.f32 %v140_v45, %v1407_v19  ;;  %v161_v58 = vadd.f32 %v144_v46, %v1409_v20 }
  0x49   :  { %v281_v59 = vmax.f32 %v279_v49, %v272_v29  ;;  %v162_v13 = vadd.f32 %v148_v47, %v1411_v21  ;;  %v406_v60 = vor.u32 %v405_v36, %v404_v35  ;;  %v293_v61 = vor.u32 %v292_v42, %v291_v37 }
  0x4a   :  { %v163_v62 = vmax.f32 %v156_v51, %v160_v57  ;;  %v164_v63 = vmax.f32 %v157_v52, %v161_v58  ;;  %v1520_v0 = vor.u32 %v631_v48, %v630_v43  ;;  %v1522_v1 = vor.u32 %v518_v54, %v517_v53 }
  0x4b   :  { %v282_v9 = vmax.f32 %v280_v50, %v281_v59  ;;  %v165_v10 = vsel %vm112_vm0, %v162_v13, -inf  ;;  %v463_v14 = vrot.slane %v406_v60, %v1385_v2  ;;  %v467_v18 = vrot.slane %v406_v60, %v1387_v3 }
  0x4c   :  { %v166_v22 = vmax.f32 %v158_v55, %v165_v10  ;;  %v167_v23 = vmax.f32 %v163_v62, %v164_v63  ;;  %v471_v24 = vrot.slane %v406_v60, %v1389_v4  ;;  %v475_v25 = vrot.slane %v406_v60, %v1391_v5 }
  0x4d   :  { %283 = vmax.xlane.f32.xlu1 %v282_v9  ;;  %v479_v26 = vrot.slane %v406_v60, %v1393_v6  ;;  %v483_v27 = vrot.slane %v406_v60, %v1395_v7  ;;  %v487_v28 = vrot.slane %v406_v60, %v1397_v8  ;;  %v495_v29 = vadd.f32 %v463_v14, %v1399_v12 }
  0x4e   :  { %v168_v30 = vmax.f32 %v166_v22, %v159_v56  ;;  %v496_v31 = vadd.f32 %v467_v18, %v1401_v15  ;;  %v497_v32 = vadd.f32 %v471_v24, %v1403_v16  ;;  %v498_v11 = vadd.f32 %v475_v25, %v1405_v17 }
  0x4f   :  { %v499_v33 = vadd.f32 %v479_v26, %v1407_v19  ;;  %v500_v34 = vadd.f32 %v483_v27, %v1409_v20  ;;  %v501_v35 = vadd.f32 %v487_v28, %v1411_v21  ;;  %v350_v36 = vrot.slane %v293_v61, %v1385_v2 }
  0x50   :  { %v169_v37 = vmax.f32 %v167_v23, %v168_v30  ;;  %v354_v38 = vrot.slane %v293_v61, %v1387_v3  ;;  %v358_v39 = vrot.slane %v293_v61, %v1389_v4  ;;  %v362_v40 = vrot.slane %v293_v61, %v1391_v5 }
  0x51   :  { %v502_v41 = vmax.f32 %v495_v29, %v499_v33  ;;  %v503_v42 = vmax.f32 %v496_v31, %v500_v34  ;;  %v504_v43 = vsel %vm112_vm0, %v501_v35, -inf  ;;  %v366_v44 = vrot.slane %v293_v61, %v1393_v6  ;;  %v857_v33 = vld [vmem:[#allocation7 + $0x7] ss:$8 sm:$0x70] }
  0x52   :  { %170 = vmax.xlane.f32.xlu0 %v169_v37  ;;  %v505_v45 = vmax.f32 %v497_v32, %v504_v43  ;;  %v370_v46 = vrot.slane %v293_v61, %v1395_v7  ;;  %v374_v47 = vrot.slane %v293_v61, %v1397_v8  ;;  %v382_v48 = vadd.f32 %v350_v36, %v1399_v12  ;;  %v743_v34 = vld [vmem:[#allocation7 + $0x6] ss:$8 sm:$0xf] }
  0x53   :  { %v506_v49 = vmax.f32 %v502_v41, %v503_v42  ;;  %v383_v50 = vadd.f32 %v354_v38, %v1401_v15  ;;  %v384_v51 = vadd.f32 %v358_v39, %v1403_v16  ;;  %v385_v52 = vadd.f32 %v362_v40, %v1405_v17  ;;  %v744_v39 = vld [vmem:[#allocation7 + $0x6] ss:$8 sm:$0x70]  ;;  %v1082_v40 = vld [vmem:[#allocation7 + $0x39] ss:$8 sm:$0xf] }
  0x54   :  { %v507_v53 = vmax.f32 %v505_v45, %v498_v11  ;;  %v386_v54 = vadd.f32 %v366_v44, %v1407_v19  ;;  %v387_v55 = vadd.f32 %v370_v46, %v1409_v20  ;;  %v388_v56 = vadd.f32 %v374_v47, %v1411_v21  ;;  %v856_v11 = vld [vmem:[#allocation7 + $0x7] ss:$8 sm:$0xf]  ;;  %v1083_v45 = vld [vmem:[#allocation7 + $0x39] ss:$8 sm:$0x70] }
  0x55   :  { %v689_v57 = vrot.slane %v1520_v0, %v1385_v2  ;;  %v693_v58 = vrot.slane %v1520_v0, %v1387_v3  ;;  %v697_v59 = vrot.slane %v1520_v0, %v1389_v4  ;;  %v701_v13 = vrot.slane %v1520_v0, %v1391_v5 }
  0x56   :  { %v508_v60 = vmax.f32 %v506_v49, %v507_v53  ;;  %v389_v61 = vmax.f32 %v382_v48, %v386_v54  ;;  %v390_v62 = vmax.f32 %v383_v50, %v387_v55  ;;  %v391_v63 = vsel %vm112_vm0, %v388_v56, -inf  ;;  %v969_v50 = vld [vmem:[#allocation7 + $0x38] ss:$8 sm:$0xf] }
  0x57   :  { %v392_v9 = vmax.f32 %v384_v51, %v391_v63  ;;  %v705_v10 = vrot.slane %v1520_v0, %v1393_v6  ;;  %v709_v14 = vrot.slane %v1520_v0, %v1395_v7  ;;  %v713_v18 = vrot.slane %v1520_v0, %v1397_v8  ;;  %v970_v51 = vld [vmem:[#allocation7 + $0x38] ss:$8 sm:$0x70] }
  0x58   :  { %509 = vmax.xlane.f32.xlu1 %v508_v60  ;;  %v393_v22 = vmax.f32 %v389_v61, %v390_v62  ;;  %v721_v23 = vadd.f32 %v689_v57, %v1399_v12  ;;  %v722_v24 = vadd.f32 %v693_v58, %v1401_v15  ;;  %v723_v25 = vadd.f32 %v697_v59, %v1403_v16 }
  0x59   :  { %v394_v26 = vmax.f32 %v392_v9, %v385_v52  ;;  %v724_v27 = vadd.f32 %v701_v13, %v1405_v17  ;;  %v725_v28 = vadd.f32 %v705_v10, %v1407_v19  ;;  %v726_v29 = vadd.f32 %v709_v14, %v1409_v20 }
  0x5a   :  { %v727_v30 = vadd.f32 %v713_v18, %v1411_v21  ;;  %v576_v0 = vrot.slane %v1522_v1, %v1385_v2  ;;  %v580_v31 = vrot.slane %v1522_v1, %v1387_v3  ;;  %v584_v32 = vrot.slane %v1522_v1, %v1389_v4 }
  0x5b   :  { %v395_v35 = vmax.f32 %v393_v22, %v394_v26  ;;  %v728_v36 = vmax.f32 %v721_v23, %v725_v28  ;;  %v729_v37 = vmax.f32 %v722_v24, %v726_v29  ;;  %v588_v38 = vrot.slane %v1522_v1, %v1391_v5 }
  0x5c   :  { %v730_v41 = vsel %vm112_vm0, %v727_v30, -inf  ;;  %v592_v42 = vrot.slane %v1522_v1, %v1393_v6  ;;  %v596_v43 = vrot.slane %v1522_v1, %v1395_v7  ;;  %v600_v44 = vrot.slane %v1522_v1, %v1397_v8 }
  0x5d   :  { %396 = vmax.xlane.f32.xlu0 %v395_v35  ;;  %v731_v46 = vmax.f32 %v723_v25, %v730_v41  ;;  %v732_v47 = vmax.f32 %v728_v36, %v729_v37  ;;  %v608_v48 = vadd.f32 %v576_v0, %v1399_v12  ;;  %v609_v49 = vadd.f32 %v580_v31, %v1401_v15 }
  0x5e   :  { %v610_v52 = vadd.f32 %v584_v32, %v1403_v16  ;;  %v611_v53 = vadd.f32 %v588_v38, %v1405_v17  ;;  %v612_v54 = vadd.f32 %v592_v42, %v1407_v19  ;;  %v613_v55 = vadd.f32 %v596_v43, %v1409_v20 }
  0x5f   :  { %v733_v56 = vmax.f32 %v731_v46, %v724_v27  ;;  %v614_v1 = vadd.f32 %v600_v44, %v1411_v21  ;;  %v858_v57 = vor.u32 %v857_v33, %v856_v11  ;;  %v745_v58 = vor.u32 %v744_v39, %v743_v34 }
  0x60   :  { %v615_v59 = vmax.f32 %v608_v48, %v612_v54  ;;  %v616_v13 = vmax.f32 %v609_v49, %v613_v55  ;;  %v1598_v60 = vor.u32 %v1083_v45, %v1082_v40  ;;  %v1600_v61 = vor.u32 %v970_v51, %v969_v50 }
  0x61   :  { %v734_v62 = vmax.f32 %v732_v47, %v733_v56  ;;  %v617_v63 = vsel %vm112_vm0, %v614_v1, -inf  ;;  %v915_v9 = vrot.slane %v858_v57, %v1385_v2  ;;  %v919_v10 = vrot.slane %v858_v57, %v1387_v3 }
  0x62   :  { %v618_v14 = vmax.f32 %v610_v52, %v617_v63  ;;  %v619_v18 = vmax.f32 %v615_v59, %v616_v13  ;;  %v923_v22 = vrot.slane %v858_v57, %v1389_v4  ;;  %v927_v23 = vrot.slane %v858_v57, %v1391_v5 }
  0x63   :  { %735 = vmax.xlane.f32.xlu1 %v734_v62  ;;  %v931_v24 = vrot.slane %v858_v57, %v1393_v6  ;;  %v935_v25 = vrot.slane %v858_v57, %v1395_v7  ;;  %v939_v26 = vrot.slane %v858_v57, %v1397_v8  ;;  %v947_v27 = vadd.f32 %v915_v9, %v1399_v12 }
  0x64   :  { %v620_v28 = vmax.f32 %v618_v14, %v611_v53  ;;  %v948_v29 = vadd.f32 %v919_v10, %v1401_v15  ;;  %v949_v30 = vadd.f32 %v923_v22, %v1403_v16  ;;  %v950_v0 = vadd.f32 %v927_v23, %v1405_v17 }
  0x65   :  { %v951_v31 = vadd.f32 %v931_v24, %v1407_v19  ;;  %v952_v32 = vadd.f32 %v935_v25, %v1409_v20  ;;  %v953_v11 = vadd.f32 %v939_v26, %v1411_v21  ;;  %v802_v33 = vrot.slane %v745_v58, %v1385_v2 }
  0x66   :  { %v621_v34 = vmax.f32 %v619_v18, %v620_v28  ;;  %v806_v35 = vrot.slane %v745_v58, %v1387_v3  ;;  %v810_v36 = vrot.slane %v745_v58, %v1389_v4  ;;  %v814_v37 = vrot.slane %v745_v58, %v1391_v5 }
  0x67   :  { %v954_v38 = vmax.f32 %v947_v27, %v951_v31  ;;  %v955_v39 = vmax.f32 %v948_v29, %v952_v32  ;;  %v956_v40 = vsel %vm112_vm0, %v953_v11, -inf  ;;  %v818_v41 = vrot.slane %v745_v58, %v1393_v6  ;;  %v175_v31 = vld [vmem:[#allocation5 + $0x1] ss:$8 sm:$0x70] }
  0x68   :  { %622 = vmax.xlane.f32.xlu0 %v621_v34  ;;  %v957_v42 = vmax.f32 %v949_v30, %v956_v40  ;;  %v822_v43 = vrot.slane %v745_v58, %v1395_v7  ;;  %v826_v44 = vrot.slane %v745_v58, %v1397_v8  ;;  %v834_v45 = vadd.f32 %v802_v33, %v1399_v12  ;;  %v61_v32 = vld [vmem:[#allocation5] ss:$8 sm:$0xf] }
  0x69   :  { %v958_v46 = vmax.f32 %v954_v38, %v955_v39  ;;  %v835_v47 = vadd.f32 %v806_v35, %v1401_v15  ;;  %v836_v48 = vadd.f32 %v810_v36, %v1403_v16  ;;  %v837_v49 = vadd.f32 %v814_v37, %v1405_v17  ;;  %v62_v36 = vld [vmem:[#allocation5] ss:$8 sm:$0x70]  ;;  %v400_v37 = vld [vmem:[#allocation5 + $0x3] ss:$8 sm:$0xf] }
  0x6a   :  { %v959_v50 = vmax.f32 %v957_v42, %v950_v0  ;;  %v838_v51 = vadd.f32 %v818_v41, %v1407_v19  ;;  %v839_v52 = vadd.f32 %v822_v43, %v1409_v20  ;;  %v840_v53 = vadd.f32 %v826_v44, %v1411_v21  ;;  %v174_v0 = vld [vmem:[#allocation5 + $0x1] ss:$8 sm:$0xf]  ;;  %v401_v42 = vld [vmem:[#allocation5 + $0x3] ss:$8 sm:$0x70] }
  0x6b   :  { %v1141_v54 = vrot.slane %v1598_v60, %v1385_v2  ;;  %v1145_v55 = vrot.slane %v1598_v60, %v1387_v3  ;;  %v1149_v56 = vrot.slane %v1598_v60, %v1389_v4  ;;  %v1153_v1 = vrot.slane %v1598_v60, %v1391_v5 }
  0x6c   :  { %v960_v57 = vmax.f32 %v958_v46, %v959_v50  ;;  %v841_v58 = vmax.f32 %v834_v45, %v838_v51  ;;  %v842_v59 = vmax.f32 %v835_v47, %v839_v52  ;;  %v843_v13 = vsel %vm112_vm0, %v840_v53, -inf  ;;  %v287_v47 = vld [vmem:[#allocation5 + $0x2] ss:$8 sm:$0xf] }
  0x6d   :  { %v844_v62 = vmax.f32 %v836_v48, %v843_v13  ;;  %v1157_v63 = vrot.slane %v1598_v60, %v1393_v6  ;;  %v1161_v9 = vrot.slane %v1598_v60, %v1395_v7  ;;  %v1165_v10 = vrot.slane %v1598_v60, %v1397_v8  ;;  %v288_v48 = vld [vmem:[#allocation5 + $0x2] ss:$8 sm:$0x70] }
  0x6e   :  { %961 = vmax.xlane.f32.xlu1 %v960_v57  ;;  %v845_v14 = vmax.f32 %v841_v58, %v842_v59  ;;  %v1173_v18 = vadd.f32 %v1141_v54, %v1399_v12  ;;  %v1174_v22 = vadd.f32 %v1145_v55, %v1401_v15  ;;  %v1175_v23 = vadd.f32 %v1149_v56, %v1403_v16 }
  0x6f   :  { %v846_v24 = vmax.f32 %v844_v62, %v837_v49  ;;  %v1176_v25 = vadd.f32 %v1153_v1, %v1405_v17  ;;  %v1177_v26 = vadd.f32 %v1157_v63, %v1407_v19  ;;  %v1178_v27 = vadd.f32 %v1161_v9, %v1409_v20 }
  0x70   :  { %v1179_v28 = vadd.f32 %v1165_v10, %v1411_v21  ;;  %v1028_v60 = vrot.slane %v1600_v61, %v1385_v2  ;;  %v1032_v29 = vrot.slane %v1600_v61, %v1387_v3  ;;  %v1036_v30 = vrot.slane %v1600_v61, %v1389_v4 }
  0x71   :  { %v847_v11 = vmax.f32 %v845_v14, %v846_v24  ;;  %v1180_v33 = vmax.f32 %v1173_v18, %v1177_v26  ;;  %v1181_v34 = vmax.f32 %v1174_v22, %v1178_v27  ;;  %v1040_v35 = vrot.slane %v1600_v61, %v1391_v5 }
  0x72   :  { %v1182_v38 = vsel %vm112_vm0, %v1179_v28, -inf  ;;  %v1044_v39 = vrot.slane %v1600_v61, %v1393_v6  ;;  %v1048_v40 = vrot.slane %v1600_v61, %v1395_v7  ;;  %v1052_v41 = vrot.slane %v1600_v61, %v1397_v8 }
  0x73   :  { %848 = vmax.xlane.f32.xlu0 %v847_v11  ;;  %v1183_v43 = vmax.f32 %v1175_v23, %v1182_v38  ;;  %v1184_v44 = vmax.f32 %v1180_v33, %v1181_v34  ;;  %v1060_v45 = vadd.f32 %v1028_v60, %v1399_v12  ;;  %v1061_v46 = vadd.f32 %v1032_v29, %v1401_v15 }
  0x74   :  { %v1062_v49 = vadd.f32 %v1036_v30, %v1403_v16  ;;  %v1063_v50 = vadd.f32 %v1040_v35, %v1405_v17  ;;  %v1064_v51 = vadd.f32 %v1044_v39, %v1407_v19  ;;  %v1065_v52 = vadd.f32 %v1048_v40, %v1409_v20 }
  0x75   :  { %v1185_v53 = vmax.f32 %v1183_v43, %v1176_v25  ;;  %v1066_v61 = vadd.f32 %v1052_v41, %v1411_v21  ;;  %v176_v54 = vor.u32 %v175_v31, %v174_v0  ;;  %v63_v55 = vor.u32 %v62_v36, %v61_v32 }
  0x76   :  { %v1067_v56 = vmax.f32 %v1060_v45, %v1064_v51  ;;  %v1068_v1 = vmax.f32 %v1061_v46, %v1065_v52  ;;  %v1676_v57 = vor.u32 %v401_v42, %v400_v37  ;;  %v1678_v58 = vor.u32 %v288_v48, %v287_v47 }
  0x77   :  { %v1186_v59 = vmax.f32 %v1184_v44, %v1185_v53  ;;  %v1069_v13 = vsel %vm112_vm0, %v1066_v61, -inf  ;;  %v185_v62 = vrot.slane %v176_v54, %v1385_v2  ;;  %v189_v63 = vrot.slane %v176_v54, %v1387_v3 }
  0x78   :  { %v1070_v9 = vmax.f32 %v1062_v49, %v1069_v13  ;;  %v1071_v10 = vmax.f32 %v1067_v56, %v1068_v1  ;;  %v193_v14 = vrot.slane %v176_v54, %v1389_v4  ;;  %v197_v18 = vrot.slane %v176_v54, %v1391_v5 }
  0x79   :  { %1187 = vmax.xlane.f32.xlu1 %v1186_v59  ;;  %v201_v22 = vrot.slane %v176_v54, %v1393_v6  ;;  %v205_v23 = vrot.slane %v176_v54, %v1395_v7  ;;  %v209_v24 = vrot.slane %v176_v54, %v1397_v8  ;;  %v217_v25 = vsub.f32 %v1399_v12, %v185_v62 }
  0x7a   :  { %v1072_v26 = vmax.f32 %v1070_v9, %v1063_v50  ;;  %v218_v27 = vsub.f32 %v1401_v15, %v189_v63  ;;  %v219_v28 = vsub.f32 %v1403_v16, %v193_v14  ;;  %v220_v60 = vsub.f32 %v1405_v17, %v197_v18 }
  0x7b   :  { %v221_v29 = vsub.f32 %v1407_v19, %v201_v22  ;;  %v222_v30 = vsub.f32 %v1409_v20, %v205_v23  ;;  %v223_v0 = vsub.f32 %v1411_v21, %v209_v24  ;;  %v71_v31 = vrot.slane %v63_v55, %v1385_v2 }
  0x7c   :  { %v1073_v32 = vmax.f32 %v1071_v10, %v1072_v26  ;;  %v75_v11 = vrot.slane %v63_v55, %v1387_v3  ;;  %v79_v33 = vrot.slane %v63_v55, %v1389_v4  ;;  %v83_v34 = vrot.slane %v63_v55, %v1391_v5 }
  0x7d   :  { %v224_v35 = vmin.f32 %v217_v25, %v221_v29  ;;  %v225_v36 = vmin.f32 %v218_v27, %v222_v30  ;;  %v226_v37 = vsel %vm112_vm0, %v223_v0, inf  ;;  %v87_v38 = vrot.slane %v63_v55, %v1393_v6 }
  0x7e   :  { %1074 = vmax.xlane.f32.xlu0 %v1073_v32  ;;  %v227_v39 = vmin.f32 %v219_v28, %v226_v37  ;;  %v91_v40 = vrot.slane %v63_v55, %v1395_v7  ;;  %v95_v41 = vrot.slane %v63_v55, %v1397_v8  ;;  %v103_v42 = vsub.f32 %v1399_v12, %v71_v31  ;;  %v626_v31 = vld [vmem:[#allocation5 + $0x5] ss:$8 sm:$0xf] }
  0x7f   :  { %v228_v43 = vmin.f32 %v224_v35, %v225_v36  ;;  %v104_v44 = vsub.f32 %v1401_v15, %v75_v11  ;;  %v105_v45 = vsub.f32 %v1403_v16, %v79_v33  ;;  %v106_v46 = vsub.f32 %v1405_v17, %v83_v34  ;;  %v627_v35 = vld [vmem:[#allocation5 + $0x5] ss:$8 sm:$0x70] }
  0x80   :  { %v229_v47 = vmin.f32 %v227_v39, %v220_v60  ;;  %v107_v48 = vsub.f32 %v1407_v19, %v87_v38  ;;  %v108_v49 = vsub.f32 %v1409_v20, %v91_v40  ;;  %v109_v50 = vsub.f32 %v1411_v21, %v95_v41  ;;  %v513_v40 = vld [vmem:[#allocation5 + $0x4] ss:$8 sm:$0xf] }
  0x81   :  { %v411_v51 = vrot.slane %v1676_v57, %v1385_v2  ;;  %v415_v52 = vrot.slane %v1676_v57, %v1387_v3  ;;  %v419_v53 = vrot.slane %v1676_v57, %v1389_v4  ;;  %v423_v61 = vrot.slane %v1676_v57, %v1391_v5  ;;  %v514_v41 = vld [vmem:[#allocation5 + $0x4] ss:$8 sm:$0x70] }
  0x82   :  { %v230_v54 = vmin.f32 %v228_v43, %v229_v47  ;;  %v110_v55 = vmin.f32 %v103_v42, %v107_v48  ;;  %v111_v56 = vmin.f32 %v104_v44, %v108_v49  ;;  %v113_v1 = vsel %vm112_vm0, %v109_v50, inf }
  0x83   :  { %v114_v59 = vmin.f32 %v105_v45, %v113_v1  ;;  %v427_v13 = vrot.slane %v1676_v57, %v1393_v6  ;;  %v431_v62 = vrot.slane %v1676_v57, %v1395_v7  ;;  %v435_v63 = vrot.slane %v1676_v57, %v1397_v8 }
  0x84   :  { %231 = vmin.xlane.f32.xlu1 %v230_v54  ;;  %v115_v9 = vmin.f32 %v110_v55, %v111_v56  ;;  %v443_v10 = vsub.f32 %v1399_v12, %v411_v51  ;;  %v444_v14 = vsub.f32 %v1401_v15, %v415_v52  ;;  %v445_v18 = vsub.f32 %v1403_v16, %v419_v53 }
  0x85   :  { %v116_v22 = vmin.f32 %v114_v59, %v106_v46  ;;  %v446_v23 = vsub.f32 %v1405_v17, %v423_v61  ;;  %v447_v24 = vsub.f32 %v1407_v19, %v427_v13  ;;  %v448_v25 = vsub.f32 %v1409_v20, %v431_v62 }
  0x86   :  { %v449_v26 = vsub.f32 %v1411_v21, %v435_v63  ;;  %v298_v57 = vrot.slane %v1678_v58, %v1385_v2  ;;  %v302_v27 = vrot.slane %v1678_v58, %v1387_v3  ;;  %v306_v28 = vrot.slane %v1678_v58, %v1389_v4 }
  0x87   :  { %v117_v60 = vmin.f32 %v115_v9, %v116_v22  ;;  %v450_v29 = vmin.f32 %v443_v10, %v447_v24  ;;  %v451_v30 = vmin.f32 %v444_v14, %v448_v25  ;;  %v310_v0 = vrot.slane %v1678_v58, %v1391_v5 }
  0x88   :  { %v452_v32 = vsel %vm112_vm0, %v449_v26, inf  ;;  %v314_v11 = vrot.slane %v1678_v58, %v1393_v6  ;;  %v318_v33 = vrot.slane %v1678_v58, %v1395_v7  ;;  %v322_v34 = vrot.slane %v1678_v58, %v1397_v8 }
  0x89   :  { %118 = vmin.xlane.f32.xlu0 %v117_v60  ;;  %v453_v36 = vmin.f32 %v445_v18, %v452_v32  ;;  %v454_v37 = vmin.f32 %v450_v29, %v451_v30  ;;  %v330_v38 = vsub.f32 %v1399_v12, %v298_v57  ;;  %v331_v39 = vsub.f32 %v1401_v15, %v302_v27 }
  0x8a   :  { %v332_v42 = vsub.f32 %v1403_v16, %v306_v28  ;;  %v334_v43 = vsub.f32 %v1407_v19, %v314_v11  ;;  %v335_v44 = vsub.f32 %v1409_v20, %v318_v33  ;;  %v336_v46 = vsub.f32 %v1411_v21, %v322_v34 }
  0x8b   :  { %v455_v45 = vmin.f32 %v453_v36, %v446_v23  ;;  %v628_v58 = vor.u32 %v627_v35, %v626_v31  ;;  %v333_v47 = vsub.f32 %v1405_v17, %v310_v0  ;;  %v515_v50 = vor.u32 %v514_v41, %v513_v40 }
  0x8c   :  { %v337_v48 = vmin.f32 %v330_v38, %v334_v43  ;;  %v338_v49 = vmin.f32 %v331_v39, %v335_v44  ;;  %v339_v52 = vsel %vm112_vm0, %v336_v46, inf  ;;  %vm1198_vm5 = vcmask 39936  }
  0x8d   :  { %v456_v51 = vmin.f32 %v454_v37, %v455_v45  ;;  %v637_v53 = vrot.slane %v628_v58, %v1385_v2  ;;  %v641_v61 = vrot.slane %v628_v58, %v1387_v3  ;;  %v340_v54 = vmin.f32 %v332_v42, %v339_v52 }
  0x8e   :  { %v341_v55 = vmin.f32 %v337_v48, %v338_v49  ;;  %v645_v56 = vrot.slane %v628_v58, %v1389_v4  ;;  %v649_v1 = vrot.slane %v628_v58, %v1391_v5  ;;  %v653_v59 = vrot.slane %v628_v58, %v1393_v6 }
  0x8f   :  { %457 = vmin.xlane.f32.xlu1 %v456_v51  ;;  %v657_v13 = vrot.slane %v628_v58, %v1395_v7  ;;  %v661_v62 = vrot.slane %v628_v58, %v1397_v8  ;;  %v669_v63 = vsub.f32 %v1399_v12, %v637_v53  ;;  %v342_v9 = vmin.f32 %v340_v54, %v333_v47 }
  0x90   :  { %v670_v10 = vsub.f32 %v1401_v15, %v641_v61  ;;  %v671_v14 = vsub.f32 %v1403_v16, %v645_v56  ;;  %v672_v18 = vsub.f32 %v1405_v17, %v649_v1  ;;  %v673_v22 = vsub.f32 %v1407_v19, %v653_v59 }
  0x91   :  { %v674_v23 = vsub.f32 %v1409_v20, %v657_v13  ;;  %v675_v24 = vsub.f32 %v1411_v21, %v661_v62  ;;  %v524_v25 = vrot.slane %v515_v50, %v1385_v2  ;;  %v343_v26 = vmin.f32 %v341_v55, %v342_v9 }
  0x92   :  { %v528_v57 = vrot.slane %v515_v50, %v1387_v3  ;;  %v532_v27 = vrot.slane %v515_v50, %v1389_v4  ;;  %v536_v28 = vrot.slane %v515_v50, %v1391_v5  ;;  %v676_v60 = vmin.f32 %v669_v63, %v673_v22 }
  0x93   :  { %v677_v29 = vmin.f32 %v670_v10, %v674_v23  ;;  %v678_v30 = vsel %vm112_vm0, %v675_v24, inf  ;;  %v540_v0 = vrot.slane %v515_v50, %v1393_v6  ;;  %344 = vmin.xlane.f32.xlu0 %v343_v26  ;;  %v544_v32 = vrot.slane %v515_v50, %v1395_v7 }
  0x94   :  { %v679_v31 = vmin.f32 %v671_v14, %v678_v30  ;;  %v548_v11 = vrot.slane %v515_v50, %v1397_v8  ;;  %v556_v2 = vsub.f32 %v1399_v12, %v524_v25  ;;  %v557_v3 = vsub.f32 %v1401_v15, %v528_v57 }
  0x95   :  { %v680_v33 = vmin.f32 %v676_v60, %v677_v29  ;;  %v558_v4 = vsub.f32 %v1403_v16, %v532_v27  ;;  %v560_v34 = vsub.f32 %v1407_v19, %v540_v0  ;;  %v561_v35 = vsub.f32 %v1409_v20, %v544_v32 }
  0x96   :  { %v681_v5 = vmin.f32 %v679_v31, %v672_v18  ;;  %v562_v6 = vsub.f32 %v1411_v21, %v548_v11  ;;  %v559_v36 = vsub.f32 %v1405_v17, %v536_v28  ;;  %vm1200_vm6 = vcmask 48128  }
  0x97   :  { %v563_v7 = vmin.f32 %v556_v2, %v560_v34  ;;  %v564_v38 = vmin.f32 %v557_v3, %v561_v35  ;;  %vm1202_vm7 = vcmask 56320   ;;  %vm1204_vm8 = vcmask 64512  }
  0x98   :  { %v682_v37 = vmin.f32 %v680_v33, %v681_v5  ;;  %v565_v8 = vsel %vm112_vm0, %v562_v6, inf  ;;  %vm1206_vm9 = vcmask 72704   ;;  %vm1208_vm10 = vcmask 80896  }
  0x99   :  { %v566_v12 = vmin.f32 %v558_v4, %v565_v8  ;;  %v567_v39 = vmin.f32 %v563_v7, %v564_v38  ;;  %vm1210_vm11 = vcmask 89088   ;;  %vm1212_vm12 = vcmask 97280  }
  0x9a   :  { %683 = vmin.xlane.f32.xlu1 %v682_v37  ;;  %vm1214_vm13 = vcmask 105472   ;;  %vm1216_vm14 = vcmask 113664   ;;  %vm1218_vm15 = vcmask 121856  }
  0x9b   :  { %v568_v15 = vmin.f32 %v566_v12, %v559_v36 }
  0x9d   :  { %v569_v40 = vmin.f32 %v567_v39, %v568_v15 }
  0x9f   :  { %570 = vmin.xlane.f32.xlu0 %v569_v40 }
  0xc0   :  { %v1785_v16 = vpop.xlane.xlu1 %1022 }
  0xc5   :  { %v1787_v19 = vpop.xlane.xlu0 %796 }
  0xcb   :  { %v1789_v20 = vpop.xlane.xlu1 %1135 }
  0xd0   :  { %v1791_v21 = vpop.xlane.xlu0 %909 }
  0xd1   :  { %v1220_v43 = vsel %vm1190_vm1, %v1787_v19, %v1791_v21 }
  0xd2   :  { %v1221_v46 = vsel %vm1192_vm2, %v1220_v43, %v1785_v16 }
  0xd3   :  { %v1222_v58 = vsel %vm1194_vm3, %v1221_v46, %v1789_v20 }
  0xd6   :  { %v284_v17 = vpop.xlane.xlu1 %283 }
  0xdb   :  { %v171_v41 = vpop.xlane.xlu0 %170 }
  0xdc   :  { %v1223_v49 = vsel %vm1196_vm4, %v1222_v58, %v171_v41 }
  0xdd   :  { %v1224_v51 = vsel %vm1198_vm5, %v1223_v49, %v284_v17 }
  0xe1   :  { %v510_v42 = vpop.xlane.xlu1 %509 }
  0xe6   :  { %v397_v44 = vpop.xlane.xlu0 %396 }
  0xe7   :  { %v1225_v52 = vsel %vm1200_vm6, %v1224_v51, %v397_v44 }
  0xe8   :  { %v1226_v54 = vsel %vm1202_vm7, %v1225_v52, %v510_v42 }
  0xec   :  { %v736_v45 = vpop.xlane.xlu1 %735 }
  0xf1   :  { %v623_v47 = vpop.xlane.xlu0 %622 }
  0xf2   :  { %v1227_v55 = vsel %vm1204_vm8, %v1226_v54, %v623_v47 }
  0xf3   :  { %v1228_v1 = vsel %vm1206_vm9, %v1227_v55, %v736_v45 }
  0xf7   :  { %v962_v48 = vpop.xlane.xlu1 %961 }
  0xf8   :  { %v963_v50 = vsub.f32 %v1791_v21, %v962_v48 }
  0xfc   :  { %v849_v53 = vpop.xlane.xlu0 %848 }
  0xfd   :  { %v850_v61 = vsub.f32 %v1787_v19, %v849_v53  ;;  %v1229_v13 = vsel %vm1208_vm10, %v1228_v1, %v849_v53 }
  0xfe   :  { %v1230_v62 = vsel %vm1210_vm11, %v1229_v13, %v962_v48 }
 0x102   :  { %v1188_v56 = vpop.xlane.xlu1 %1187 }
 0x103   :  { %v1189_v59 = vsub.f32 %v1789_v20, %v1188_v56 }
 0x107   :  { %v1075_v63 = vpop.xlane.xlu0 %1074 }
 0x108   :  { %v1076_v9 = vsub.f32 %v1785_v16, %v1075_v63  ;;  %v1231_v10 = vsel %vm1212_vm12, %v1230_v62, %v1075_v63 }
 0x109   :  { %v1232_v14 = vsel %vm1214_vm13, %v1231_v10, %v1188_v56 }
 0x10a   :  { %v1233_v18 = vsel %vm1216_vm14, %v1232_v14, 0.0 }
 0x10b   :  { %1235 = vrot.lane.b32.xlu0 %v1233_v18, %s1354_s0 }
 0x10d   :  { %v232_v22 = vpop.xlane.xlu1 %231 }
 0x10e   :  { %v285_v23 = vsub.f32 %v232_v22, %v284_v17 }
 0x112   :  { %v119_v24 = vpop.xlane.xlu0 %118 }
 0x113   :  { %v172_v25 = vsub.f32 %v119_v24, %v171_v41 }
 0x115   :  { %v1191_v26 = vsel %vm1190_vm1, %v172_v25, %v285_v23 }
 0x118   :  { %v458_v57 = vpop.xlane.xlu1 %457 }
 0x119   :  { %v511_v27 = vsub.f32 %v458_v57, %v510_v42 }
 0x11c   :  { %v345_v28 = vpop.xlane.xlu0 %344 }
 0x11d   :  { %v398_v60 = vsub.f32 %v345_v28, %v397_v44 }
 0x11f   :  { %v1193_v29 = vsel %vm1192_vm2, %v1191_v26, %v398_v60 }
 0x120   :  { %v1195_v30 = vsel %vm1194_vm3, %v1193_v29, %v511_v27 }
 0x123   :  { %v684_v0 = vpop.xlane.xlu1 %683 }
 0x124   :  { %v737_v31 = vsub.f32 %v684_v0, %v736_v45 }
 0x128   :  { %v571_v32 = vpop.xlane.xlu0 %570 }
 0x129   :  { %v624_v11 = vsub.f32 %v571_v32, %v623_v47 }
 0x12b   :  { %v1197_v2 = vsel %vm1196_vm4, %v1195_v30, %v624_v11 }
 0x12c   :  { %v1199_v33 = vsel %vm1198_vm5, %v1197_v2, %v737_v31 }
 0x12d   :  { %v1201_v3 = vsel %vm1200_vm6, %v1199_v33, %v850_v61 }
 0x12e   :  { %v1203_v4 = vsel %vm1202_vm7, %v1201_v3, %v963_v50 }
 0x12f   :  { %v1205_v5 = vsel %vm1204_vm8, %v1203_v4, %v1076_v9 }
 0x130   :  { %v1207_v34 = vsel %vm1206_vm9, %v1205_v5, %v1189_v59 }
 0x131   :  { %v1209_v35 = vsel %vm1208_vm10, %v1207_v34, %v119_v24 }
 0x132   :  { %v1211_v6 = vsel %vm1210_vm11, %v1209_v35, %v232_v22 }
 0x133   :  { %v1213_v36 = vsel %vm1212_vm12, %v1211_v6, %v345_v28 }
 0x134   :  { %v1215_v37 = vsel %vm1214_vm13, %v1213_v36, %v458_v57 }
 0x135   :  { %v1217_v7 = vsel %vm1216_vm14, %v1215_v37, %v571_v32 }
 0x136   :  { %v1219_v38 = vsel %vm1218_vm15, %v1217_v7, %v684_v0 }
 0x17d   :  { %v1236_v8 = vpop.permute.xlu0 %1235 }
 0x17e   :  { %v1238_v12 = vsel %vm112_vm0, %v1219_v38, %v1236_v8 }
 0x17f   :  { %1239 = vst [vmem:[#allocation8] sm:$0xff] %v1238_v12 }
 0x180   :  { %1334 = shalt.err (!%p1331_p5)
}
 0x181   :  { %1249 = dma.vmem_to_hbm [thread:$0]  %s1247_s28, 128, %s1836_s3, [#allocation4]  }
 0x182   :  { %1347 = dma.done.wait [#allocation4], 128  }
 0x183   :  { %1348 = vsyncadd [#allocation4], 4294967168 }
 0x184   :  { %1253 = vsyncpa [#allocation3], 1 }
 0x185   :  { %1254 = vsyncpa [#allocation6], 1 }
 0x186   :  { %1255 = vsyncpa [#allocation4], 1 }

</bundles_post_ra>
